<compile_context>
chip_gen: v7x
topology: tpu7x:2x2x1
jax: 0.10.0
libtpu: 0.0.40
codegen_flags: <defaults>
</compile_context>

<pallas_src>
import functools

import jax
import jax.numpy as jnp
from jax.experimental import pallas as pl
from jax.experimental.pallas import tpu as pltpu


def _ffn_kernel(x_ref, w1_ref, b1_ref, w2_ref, b2_ref, gamma_ref, beta_ref,
                out_ref, *, eps):
    x = x_ref[...]                                    # (TM, d_in), input dtype
    w1 = w1_ref[...]                                  # (d_in, d_hid)
    w2 = w2_ref[...]                                  # (d_hid, d_in)

    # ---- w_1 + ReLU (MXU, f32 accumulate) ---------------------------------
    h = jnp.dot(x, w1, preferred_element_type=jnp.float32)       # (TM, d_hid)
    h = h + b1_ref[...].astype(jnp.float32)
    h = jnp.maximum(h, 0.0)

    # ---- w_2 ---------------------------------------------------------------
    y = jnp.dot(h.astype(w2.dtype), w2, preferred_element_type=jnp.float32)
    y = y + b2_ref[...].astype(jnp.float32)                      # (TM, d_in)

    # TODO(synk): nn.Dropout(0.1) is identity in eval mode; training-mode
    # stochastic dropout (pltpu.prng_*) is intentionally not applied here.

    # ---- residual + LayerNorm (eps=1e-6, biased variance, affine) ----------
    y = y + x.astype(jnp.float32)
    mean = jnp.mean(y, axis=-1, keepdims=True)
    c = y - mean
    var = jnp.mean(c * c, axis=-1, keepdims=True)
    inv = jax.lax.rsqrt(var + eps)                                # EUP rsqrt
    out = c * inv * gamma_ref[...].astype(jnp.float32) \
        + beta_ref[...].astype(jnp.float32)

    out_ref[...] = out.astype(out_ref.dtype)


def positionwise_feed_forward(x, w1, b1, w2, b2, gamma, beta, *,
                              eps=1e-6, row_block=256):
    """Fused FFN + residual + LayerNorm.

    x:     [..., d_in]
    w1:    [d_in, d_hid]   (already transposed from PyTorch's [d_hid, d_in])
    b1:    [d_hid]
    w2:    [d_hid, d_in]   (already transposed from PyTorch's [d_in, d_hid])
    b2, gamma, beta: [d_in]
    """
    orig_shape = x.shape
    d_in = orig_shape[-1]
    d_hid = w1.shape[1]

    n = 1
    for s in orig_shape[:-1]:
        n *= s
    xf = x.reshape(n, d_in)

    # Row tile: as large as sensible, multiple of 8 (sublane); pad N up to it.
    tm = min(row_block, ((n + 7) // 8) * 8)
    n_pad = pl.cdiv(n, tm) * tm
    if n_pad != n:
        xf = jnp.pad(xf, ((0, n_pad - n), (0, 0)))

    b1_2d = b1.reshape(1, d_hid)
    b2_2d = b2.reshape(1, d_in)
    g_2d = gamma.reshape(1, d_in)
    bt_2d = beta.reshape(1, d_in)

    kernel = functools.partial(_ffn_kernel, eps=float(eps))

    out = pl.pallas_call(
        kernel,
        out_shape=jax.ShapeDtypeStruct((n_pad, d_in), x.dtype),
        grid_spec=pltpu.PrefetchScalarGridSpec(
            num_scalar_prefetch=0,
            grid=(n_pad // tm,),
            in_specs=[
                pl.BlockSpec((tm, d_in), lambda i: (i, 0)),       # x tile
                pl.BlockSpec((d_in, d_hid), lambda i: (0, 0)),    # w1 (resident)
                pl.BlockSpec((1, d_hid), lambda i: (0, 0)),       # b1
                pl.BlockSpec((d_hid, d_in), lambda i: (0, 0)),    # w2 (resident)
                pl.BlockSpec((1, d_in), lambda i: (0, 0)),        # b2
                pl.BlockSpec((1, d_in), lambda i: (0, 0)),        # gamma
                pl.BlockSpec((1, d_in), lambda i: (0, 0)),        # beta
            ],
            out_specs=pl.BlockSpec((tm, d_in), lambda i: (i, 0)),
        ),
        compiler_params=pltpu.CompilerParams(
            dimension_semantics=("parallel",)),
    )(xf, w1, b1_2d, w2, b2_2d, g_2d, bt_2d)

    if n_pad != n:
        out = out[:n]
    return out.reshape(orig_shape)


def _reference(x, w1, b1, w2, b2, gamma, beta, eps=1e-6):
    h = jnp.maximum(x @ w1 + b1, 0.0)
    y = h @ w2 + b2 + x
    mean = jnp.mean(y, axis=-1, keepdims=True)
    var = jnp.mean((y - mean) ** 2, axis=-1, keepdims=True)
    return (y - mean) * jax.lax.rsqrt(var + eps) * gamma + beta


if __name__ == "__main__":
    key = jax.random.PRNGKey(0)
    kx, kw1, kb1, kw2, kb2, kg, kbt, kx2 = jax.random.split(key, 8)

    B, L, d_in, d_hid = 2, 8, 32, 64

    x = jax.random.normal(kx, (B, L, d_in), dtype=jnp.float32)
    # Parameters (stored in the layout the kernel consumes: [in, out]).
    w1 = jax.random.normal(kw1, (d_in, d_hid), dtype=jnp.float32) * 0.1
    b1 = jax.random.normal(kb1, (d_hid,), dtype=jnp.float32) * 0.1
    w2 = jax.random.normal(kw2, (d_hid, d_in), dtype=jnp.float32) * 0.1
    b2 = jax.random.normal(kb2, (d_in,), dtype=jnp.float32) * 0.1
    gamma = 1.0 + 0.1 * jax.random.normal(kg, (d_in,), dtype=jnp.float32)
    beta = 0.1 * jax.random.normal(kbt, (d_in,), dtype=jnp.float32)

    out = positionwise_feed_forward(x, w1, b1, w2, b2, gamma, beta)
    out = jax.block_until_ready(out)
    ref = _reference(x, w1, b1, w2, b2, gamma, beta)
    assert out.shape == x.shape
    assert jnp.allclose(out, ref, atol=1e-5, rtol=1e-5)

    # Also exercise the padding path (token count not a multiple of 8).
    x2 = jax.random.normal(kx2, (3, 5, d_in), dtype=jnp.float32)
    out2 = positionwise_feed_forward(x2, w1, b1, w2, b2, gamma, beta)
    out2 = jax.block_until_ready(out2)
    ref2 = _reference(x2, w1, b1, w2, b2, gamma, beta)
    assert jnp.allclose(out2, ref2, atol=1e-5, rtol=1e-5)

    print("KERNEL_OK")
</pallas_src>

<mosaic_0001>
module attributes {stable_mosaic.version = 11 : i64} {
  func.func @_ffn_kernel(%arg0: i32, %arg1: memref<16x32xf32, #tpu.memory_space<vmem>>, %arg2: memref<32x64xf32, #tpu.memory_space<vmem>>, %arg3: memref<1x64xf32, #tpu.memory_space<vmem>>, %arg4: memref<64x32xf32, #tpu.memory_space<vmem>>, %arg5: memref<1x32xf32, #tpu.memory_space<vmem>>, %arg6: memref<1x32xf32, #tpu.memory_space<vmem>>, %arg7: memref<1x32xf32, #tpu.memory_space<vmem>>, %arg8: memref<16x32xf32, #tpu.memory_space<vmem>>) attributes {dimension_semantics = [#tpu.dimension_semantics<parallel>], iteration_bounds = array<i64: 1>, scalar_prefetch = 0 : i64, scratch_operands = 0 : i64, tpu.core_type = #tpu.core_type<tc>, window_params = [{transform_indices = @transform_0, window_bounds = array<i64: 16, 32>}, {pipeline_mode = #tpu.pipeline_mode<synchronous>, transform_indices = @transform_1, window_bounds = array<i64: 32, 64>}, {pipeline_mode = #tpu.pipeline_mode<synchronous>, transform_indices = @transform_2, window_bounds = array<i64: 1, 64>}, {pipeline_mode = #tpu.pipeline_mode<synchronous>, transform_indices = @transform_3, window_bounds = array<i64: 64, 32>}, {pipeline_mode = #tpu.pipeline_mode<synchronous>, transform_indices = @transform_4, window_bounds = array<i64: 1, 32>}, {pipeline_mode = #tpu.pipeline_mode<synchronous>, transform_indices = @transform_5, window_bounds = array<i64: 1, 32>}, {pipeline_mode = #tpu.pipeline_mode<synchronous>, transform_indices = @transform_6, window_bounds = array<i64: 1, 32>}, {transform_indices = @transform_7, window_bounds = array<i64: 16, 32>}]} {
    %c0 = arith.constant 0 : index
    %c0_0 = arith.constant 0 : index
    %0 = vector.load %arg1[%c0, %c0_0] : memref<16x32xf32, #tpu.memory_space<vmem>>, vector<16x32xf32>
    %c0_1 = arith.constant 0 : index
    %c0_2 = arith.constant 0 : index
    %1 = vector.load %arg2[%c0_1, %c0_2] : memref<32x64xf32, #tpu.memory_space<vmem>>, vector<32x64xf32>
    %c0_3 = arith.constant 0 : index
    %c0_4 = arith.constant 0 : index
    %2 = vector.load %arg4[%c0_3, %c0_4] : memref<64x32xf32, #tpu.memory_space<vmem>>, vector<64x32xf32>
    %cst = arith.constant dense<0.000000e+00> : vector<16x64xf32>
    %3 = tpu.matmul %0, %1, %cst {dimension_numbers = #tpu.dot_dimension_numbers<[1], [0], [0], [1], [0, 0, 1, 1], [], []>} : vector<16x32xf32>, vector<32x64xf32>, vector<16x64xf32> -> vector<16x64xf32>
    %c0_5 = arith.constant 0 : index
    %c0_6 = arith.constant 0 : index
    %4 = vector.load %arg3[%c0_5, %c0_6] : memref<1x64xf32, #tpu.memory_space<vmem>>, vector<1x64xf32>
    %5 = vector.broadcast %4 : vector<1x64xf32> to vector<16x64xf32>
    %6 = arith.addf %3, %5 : vector<16x64xf32>
    %cst_7 = arith.constant 0.000000e+00 : f32
    %7 = vector.broadcast %cst_7 : f32 to vector<16x64xf32>
    %8 = arith.maximumf %6, %7 : vector<16x64xf32>
    %cst_8 = arith.constant dense<0.000000e+00> : vector<16x32xf32>
    %9 = tpu.matmul %8, %2, %cst_8 {dimension_numbers = #tpu.dot_dimension_numbers<[1], [0], [0], [1], [0, 0, 1, 1], [], []>} : vector<16x64xf32>, vector<64x32xf32>, vector<16x32xf32> -> vector<16x32xf32>
    %c0_9 = arith.constant 0 : index
    %c0_10 = arith.constant 0 : index
    %10 = vector.load %arg5[%c0_9, %c0_10] : memref<1x32xf32, #tpu.memory_space<vmem>>, vector<1x32xf32>
    %11 = vector.broadcast %10 : vector<1x32xf32> to vector<16x32xf32>
    %12 = arith.addf %9, %11 : vector<16x32xf32>
    %13 = arith.addf %12, %0 : vector<16x32xf32>
    %cst_11 = arith.constant dense<0.000000e+00> : vector<16xf32>
    %14 = vector.multi_reduction <add>, %13, %cst_11 [1] : vector<16x32xf32> to vector<16xf32>
    %15 = vector.shape_cast %14 : vector<16xf32> to vector<16x1xf32>
    %cst_12 = arith.constant 3.200000e+01 : f32
    %16 = vector.broadcast %cst_12 : f32 to vector<16x1xf32>
    %17 = arith.divf %15, %16 : vector<16x1xf32>
    %18 = vector.broadcast %17 : vector<16x1xf32> to vector<16x32xf32>
    %19 = arith.subf %13, %18 : vector<16x32xf32>
    %20 = arith.mulf %19, %19 : vector<16x32xf32>
    %cst_13 = arith.constant dense<0.000000e+00> : vector<16xf32>
    %21 = vector.multi_reduction <add>, %20, %cst_13 [1] : vector<16x32xf32> to vector<16xf32>
    %22 = vector.shape_cast %21 : vector<16xf32> to vector<16x1xf32>
    %cst_14 = arith.constant 3.200000e+01 : f32
    %23 = vector.broadcast %cst_14 : f32 to vector<16x1xf32>
    %24 = arith.divf %22, %23 : vector<16x1xf32>
    %cst_15 = arith.constant 9.99999997E-7 : f32
    %25 = vector.broadcast %cst_15 : f32 to vector<16x1xf32>
    %26 = arith.addf %24, %25 : vector<16x1xf32>
    %27 = math.rsqrt %26 : vector<16x1xf32>
    %28 = vector.broadcast %27 : vector<16x1xf32> to vector<16x32xf32>
    %29 = arith.mulf %19, %28 : vector<16x32xf32>
    %c0_16 = arith.constant 0 : index
    %c0_17 = arith.constant 0 : index
    %30 = vector.load %arg6[%c0_16, %c0_17] : memref<1x32xf32, #tpu.memory_space<vmem>>, vector<1x32xf32>
    %31 = vector.broadcast %30 : vector<1x32xf32> to vector<16x32xf32>
    %32 = arith.mulf %29, %31 : vector<16x32xf32>
    %c0_18 = arith.constant 0 : index
    %c0_19 = arith.constant 0 : index
    %33 = vector.load %arg7[%c0_18, %c0_19] : memref<1x32xf32, #tpu.memory_space<vmem>>, vector<1x32xf32>
    %34 = vector.broadcast %33 : vector<1x32xf32> to vector<16x32xf32>
    %35 = arith.addf %32, %34 : vector<16x32xf32>
    %c0_20 = arith.constant 0 : index
    %c0_21 = arith.constant 0 : index
    %36 = vector.load %arg8[%c0_20, %c0_21] : memref<16x32xf32, #tpu.memory_space<vmem>>, vector<16x32xf32>
    tpu.vector_store %arg8[%c0_20, %c0_21], %35 {strides = array<i32>} : memref<16x32xf32, #tpu.memory_space<vmem>>, vector<16x32xf32>,
    return
  }
  func.func @transform_0(%arg0: i32) -> (i32, i32) {
    %c0_i32 = arith.constant 0 : i32
    %c0_i32_0 = arith.constant 0 : i32
    return %arg0, %c0_i32 : i32, i32
  }
  func.func @transform_1(%arg0: i32) -> (i32, i32) {
    %c0_i32 = arith.constant 0 : i32
    %c0_i32_0 = arith.constant 0 : i32
    %c0_i32_1 = arith.constant 0 : i32
    return %c0_i32, %c0_i32_0 : i32, i32
  }
  func.func @transform_2(%arg0: i32) -> (i32, i32) {
    %c0_i32 = arith.constant 0 : i32
    %c0_i32_0 = arith.constant 0 : i32
    %c0_i32_1 = arith.constant 0 : i32
    return %c0_i32, %c0_i32_0 : i32, i32
  }
  func.func @transform_3(%arg0: i32) -> (i32, i32) {
    %c0_i32 = arith.constant 0 : i32
    %c0_i32_0 = arith.constant 0 : i32
    %c0_i32_1 = arith.constant 0 : i32
    return %c0_i32, %c0_i32_0 : i32, i32
  }
  func.func @transform_4(%arg0: i32) -> (i32, i32) {
    %c0_i32 = arith.constant 0 : i32
    %c0_i32_0 = arith.constant 0 : i32
    %c0_i32_1 = arith.constant 0 : i32
    return %c0_i32, %c0_i32_0 : i32, i32
  }
  func.func @transform_5(%arg0: i32) -> (i32, i32) {
    %c0_i32 = arith.constant 0 : i32
    %c0_i32_0 = arith.constant 0 : i32
    %c0_i32_1 = arith.constant 0 : i32
    return %c0_i32, %c0_i32_0 : i32, i32
  }
  func.func @transform_6(%arg0: i32) -> (i32, i32) {
    %c0_i32 = arith.constant 0 : i32
    %c0_i32_0 = arith.constant 0 : i32
    %c0_i32_1 = arith.constant 0 : i32
    return %c0_i32, %c0_i32_0 : i32, i32
  }
  func.func @transform_7(%arg0: i32) -> (i32, i32) {
    %c0_i32 = arith.constant 0 : i32
    %c0_i32_0 = arith.constant 0 : i32
    return %arg0, %c0_i32 : i32, i32
  }
}

</mosaic_0001>

<bundles_post_ra>
// kernel: tpu_custom_call.1
= control target key start
LH: loop header
LB: loop body
LE: loop exit
PB: predicated region body
PF: predicated region fallthrough
CT: control target
= control target key end

     0   :  { %vm48_vm0 = vcmask 261120   ;;  %s512_s0 = inlined_call_operand.vmem [shape: f32[16,32], index: 0, kind: input, shape index: {}]   ;;  %s513_s1 = inlined_call_operand.vmem [shape: f32[32,64], index: 1, kind: input, shape index: {}]   ;;  %s514_s2 = inlined_call_operand.vmem [shape: f32[1,64], index: 2, kind: input, shape index: {}]   ;;  %s515_s3 = inlined_call_operand.vmem [shape: f32[64,32], index: 3, kind: input, shape index: {}]   ;;  %s516_s4 = inlined_call_operand.vmem [shape: f32[1,32], index: 4, kind: input, shape index: {}]   ;;  %s517_s5 = inlined_call_operand.vmem [shape: f32[1,32], index: 5, kind: input, shape index: {}]   ;;  %s518_s6 = inlined_call_operand.vmem [shape: f32[1,32], index: 6, kind: input, shape index: {}]   ;;  %s519_s7 = inlined_call_operand.hbm [shape: f32[16,32], index: 7, kind: output, shape index: {}]  }
   0x1   :  { %v29_v0 = vld [vmem:[%s513_s1] sm:$0xff]  ;;  %v30_v1 = vld [vmem:[%s513_s1 + $0x8] sm:$0xff]  ;;  %v31_v2 = vld [vmem:[%s513_s1 + $0x10] sm:$0xff] }
   0x2   :  { %v340_v3 = vpack.c.bf16 %v30_v1, %v29_v0  ;;  %v32_v4 = vld [vmem:[%s513_s1 + $0x18] sm:$0xff]  ;;  %v27_v5 = vld [vmem:[%s512_s0] sm:$0xff]  ;;  %v34_v8 = vld [vmem:[%s515_s3 + $0x8] sm:$0xff] }
   0x3   :  { %v344_v6 = vpack.c.bf16 %v32_v4, %v31_v2  ;;  %318 = vmatprep.mubr.msk.f32.mxu0 %vm48_vm0, %v27_v5  ;;  %v33_v7 = vld [vmem:[%s515_s3] sm:$0xff]  ;;  %v35_v9 = vld [vmem:[%s515_s3 + $0x10] sm:$0xff]  ;;  %v36_v11 = vld [vmem:[%s515_s3 + $0x18] sm:$0xff] }
   0x4   :  { %341 = vmatprep.subr.bf16.mxu0 %v340_v3  ;;  %v348_v10 = vpack.c.bf16 %v34_v8, %v33_v7  ;;  %v352_v12 = vpack.c.bf16 %v36_v11, %v35_v9  ;;  %v37_v13 = vld [vmem:[%s515_s3 + $0x20] sm:$0xff]  ;;  %v38_v14 = vld [vmem:[%s515_s3 + $0x28] sm:$0xff] }
   0x5   :  { %343 = vmatpush3.bf16.msra.mxu0 %v340_v3 }
   0x6   :  { %12 = vsyncpa [#allocation3], 0  ;;  %345 = vmatprep.subr.bf16.mxu0 %v344_v6  ;;  %349 = vmatprep.subr.bf16.mxu1 %v348_v10  ;;  %v356_v15 = vpack.c.bf16 %v38_v14, %v37_v13  ;;  %v28_v16 = vld [vmem:[%s512_s0 + $0x8] sm:$0xff]  ;;  %v39_v17 = vld [vmem:[%s515_s3 + $0x30] sm:$0xff]  ;;  %vm139_vm1 = vcmask 523264   ;;  %s395_s9 = smov [#allocation2]  }
   0x7   :  { %351 = vmatpush3.bf16.msra.mxu1 %v348_v10  ;;  %v40_v18 = vld [vmem:[%s515_s3 + $0x38] sm:$0xff]  ;;  %v286_v20 = vld [vmem:[%s514_s2] ss:$0 sm:$0xff]  ;;  %s275_s10 = sshll.u32 %s395_s9, 4  ;;  %s276_s10 = int_to_ptr.vmem [resolvable:$true] %s275_s10 }
   0x8   :  { %353 = vmatprep.subr.bf16.mxu1 %v352_v12  ;;  %v360_v19 = vpack.c.bf16 %v40_v18, %v39_v17  ;;  %v289_v27 = vld [vmem:[%s516_s4] ss:$0 sm:$0xff]  ;;  %s371_s11 = scalar_lea.vmem %s276_s10, 256  ;;  %p376_p1 = scmp.lt.s32.totalorder %s276_s10, %s276_s10 }
   0x9   :  { %347 = vmatpush3.bf16.msra.mxu0 %v344_v6  ;;  %v292_v53 = vld [vmem:[%s517_s5] ss:$0 sm:$0xff]  ;;  %p372_p0 = scmp.ne.s32.totalorder %s276_s10, %s371_s11  ;;  %p377_p2 = scmp.lt.s32.totalorder %s371_s11, %s371_s11 }
   0xa   :  { %v293_v55 = vld [vmem:[%s518_s6] ss:$0 sm:$0xff] }
   0xb   :  { %355 = vmatpush3.bf16.msra.mxu1 %v352_v12  ;;  %p378_p3 = por %p377_p2, %p376_p1 }
   0xc   :  { %319 = vmatmul.mubr.msk.f32.vlgmr.msra.gmra.mrb[0].mxu0 %vm48_vm0, %v28_v16  ;;  %357 = vmatprep.subr.bf16.mxu1 %v356_v15 }
   0xd   :  { %p379_p4 = pnand %p378_p3, %p372_p0 }
   0xf   :  { %359 = vmatpush3.bf16.msra.mxu1 %v356_v15 }
  0x10   :  { %361 = vmatprep.subr.bf16.mxu1 %v360_v19 }
  0x13   :  { %363 = vmatpush3.bf16.msra.mxu1 %v360_v19 }
  0xdf   :  { %v320_v21 = vpop.f32.mrb[0].mxu0 }
  0xe0   :  { %v127_v22 = vadd.f32 %v320_v21, %v286_v20  ;;  %v121_v23 = vpop.f32.mrb[1].mxu0 }
  0xe1   :  { %v122_v24 = vadd.f32 %v286_v20, %v121_v23 }
  0xe2   :  { %v131_v26 = vmax.f32 %v127_v22, 0.0 }
  0xe3   :  { %v130_v25 = vmax.f32 %v122_v24, 0.0 }
  0xe5   :  { %337 = vmatprep.mubr.msk.f32.mxu1 %vm139_vm1, %v130_v25 }
  0xe6   :  { %338 = vmatmul.mubr.msk.f32.vlgmr.msra.gmra.mrb[0].mxu1 %vm139_vm1, %v131_v26 }
 0x1b9   :  { %v339_v28 = vpop.f32.mrb[0].mxu1 }
 0x1ba   :  { %v212_v29 = vpop.f32.mrb[1].mxu1  ;;  %v218_v30 = vadd.f32 %v339_v28, %v289_v27 }
 0x1bb   :  { %v213_v31 = vadd.f32 %v289_v27, %v212_v29 }
 0x1bc   :  { %v222_v34 = vadd.f32 %v218_v30, %v28_v16 }
 0x1bd   :  { %v221_v32 = vadd.f32 %v213_v31, %v27_v5 }
 0x1be   :  { %v226_v35 = vsel %vm48_vm0, %v222_v34, 0.0 }
 0x1bf   :  { %v223_v33 = vsel %vm48_vm0, %v221_v32, 0.0 }
 0x1c0   :  { %224 = vadd.xlane.f32.xlu0 %v223_v33 }
 0x1c4   :  { %227 = vadd.xlane.f32.xlu0 %v226_v35 }
 0x24d   :  { %v225_v36 = vpop.xlane.xlu0 %224 }
 0x24e   :  { %v230_v37 = vmul.f32 0.03125, %v225_v36 }
 0x250   :  { %v232_v38 = vsub.f32 %v221_v32, %v230_v37 }
 0x251   :  { %v228_v39 = vpop.xlane.xlu0 %227 }
 0x252   :  { %v231_v40 = vmul.f32 0.03125, %v228_v39  ;;  %v234_v41 = vmul.f32 %v232_v38, %v232_v38 }
 0x254   :  { %v233_v42 = vsub.f32 %v222_v34, %v231_v40  ;;  %v236_v43 = vsel %vm48_vm0, %v234_v41, 0.0 }
 0x255   :  { %237 = vadd.xlane.f32.xlu1 %v236_v43 }
 0x256   :  { %v235_v44 = vmul.f32 %v233_v42, %v233_v42 }
 0x258   :  { %v239_v45 = vsel %vm48_vm0, %v235_v44, 0.0 }
 0x259   :  { %240 = vadd.xlane.f32.xlu1 %v239_v45 }
 0x2e2   :  { %v238_v46 = vpop.xlane.xlu1 %237 }
 0x2e3   :  { %v242_v47 = vmul.f32 0.03125, %v238_v46 }
 0x2e5   :  { %v244_v48 = vadd.f32 1e-06, %v242_v47 }
 0x2e6   :  { %v241_v49 = vpop.xlane.xlu1 %240 }
 0x2e7   :  { %367 = vrsqrt.f32 %v244_v48  ;;  %v243_v50 = vmul.f32 0.03125, %v241_v49 }
 0x2e9   :  { %v245_v51 = vadd.f32 1e-06, %v243_v50 }
 0x2eb   :  { %369 = vrsqrt.f32 %v245_v51 }
 0x2f1   :  { %v368_v52 = vpop.eup %367 }
 0x2f2   :  { %v248_v54 = vmul.f32 %v368_v52, %v232_v38 }
 0x2f4   :  { %v257_v56 = vmul.f32 %v292_v53, %v248_v54 }
 0x2f5   :  { %v370_v57 = vpop.eup %369 }
 0x2f6   :  { %v249_v58 = vmul.f32 %v370_v57, %v233_v42  ;;  %v266_v59 = vadd.f32 %v293_v55, %v257_v56 }
 0x2f8   :  { %v258_v60 = vmul.f32 %v292_v53, %v249_v58  ;;  %268 = vst.msk [vmem:[#allocation2] sm:$0xff] %vm48_vm0, %v266_v59 }
 0x2fa   :  { %v267_v61 = vadd.f32 %v293_v55, %v258_v60 }
 0x2fc   :  { %269 = vst.msk [vmem:[#allocation2 + $0x8] sm:$0xff] %vm48_vm0, %v267_v61 }
 0x2fd   :  { %382 = shalt.err (!%p379_p4)
}
 0x2fe   :  { %s383_s12 = scalar_lea.hbm %s519_s7, 256 }
 0x2ff   :  { %p384_p5 = scmp.ne.s32.totalorder %s519_s7, %s383_s12  ;;  %p387_p6 = scmp.lt.u32.totalorder %s383_s12, %s519_s7 }
 0x301   :  { %p389_p7 = pnand %p387_p6, %p384_p5 }
 0x303   :  { %392 = shalt.err (!%p389_p7)
}
 0x304   :  { %s396_s1 = smov 128   ;;  %s397_s17 = smov 8  }
 0x305   :  { %281 = dma.vmem_to_hbm [thread:$0]  %s276_s10, 256, %s519_s7, [#allocation3], %s396_s1, %s396_s1, %s397_s17  }
 0x306   :  { %393 = dma.done.wait [#allocation3], 256  }
 0x307   :  { %394 = vsyncadd [#allocation3], 4294967040 }
 0x308   :  { %285 = vsyncpa [#allocation3], 1 }

</bundles_post_ra>
